<compile_context>
chip_gen: v7x
topology: tpu7x:2x2x1
jax: 0.10.0
libtpu: 0.0.40
codegen_flags: <defaults>
</compile_context>

<pallas_src>
import functools

import jax
import jax.numpy as jnp
from jax.experimental import pallas as pl
from jax.experimental.pallas import tpu as pltpu


def _round_up(x, m):
    return (x + m - 1) // m * m


def _physical_vmem_bytes():
    """Best-effort physical VMEM capacity; conservative (v7x) fallback."""
    try:
        info = pltpu.get_tpu_info()
        cap = getattr(info, "vmem_capacity_bytes", None)
        if cap:
            return int(cap)
    except Exception:
        pass
    return 64 * 1024 * 1024


# ---------------------------------------------------------------------------
# Kernels
# ---------------------------------------------------------------------------
def _resident_gather_kernel(ids_ref, table_ref, out_ref, *, t_blk):
    # ids_ref   : SMEM (n_pad,) int32   -- scalar-prefetch token ids (pre-clamped)
    # table_ref : VMEM (v_pad, d_pad)   -- whole table, untiled => single buffer
    # out_ref   : VMEM (t_blk, d_pad)
    base = pl.program_id(0) * t_blk
    # Static Python unroll: static store offsets (dense lane-wide vst), dynamic
    # row reads from the resident table.
    for t in range(t_blk):
        tok = ids_ref[base + t]                      # cheap SMEM scalar read
        out_ref[pl.ds(t, 1), :] = table_ref[pl.ds(tok, 1), :]


def _hbm_row_gather_kernel(ids_ref, row_ref, out_ref):
    # ids_ref is only consumed by the data-dependent index_maps.
    del ids_ref
    out_ref[...] = row_ref[...]                      # bit-exact row copy


# ---------------------------------------------------------------------------
# Forward
# ---------------------------------------------------------------------------
def word_rep_forward(sentence, embed_table, *, force_hbm_fallback=False,
                     tiny_token_threshold=0):
    """Equivalent of WordRep.forward([sentence]) -> embedding(sentence)."""
    B, S = sentence.shape
    V, D = embed_table.shape
    n_tok = B * S

    flat_ids = jnp.clip(sentence.reshape(-1).astype(jnp.int32), 0, V - 1)

    # Optional tiny-input escape hatch (XLA gather beats any kernel for a
    # handful of tokens).  Default 0 so the Pallas kernel always runs here.
    if n_tok <= tiny_token_threshold:
        return jnp.take(embed_table, flat_ids, axis=0).reshape(B, S, D)

    d_pad = _round_up(D, 128)                        # lane-dense rows / stores
    table_pad_d = embed_table
    if d_pad != D:
        table_pad_d = jnp.pad(embed_table, ((0, 0), (0, d_pad - D)))

    vmem_cap = _physical_vmem_bytes()

    # ---------------- VMEM-resident fast path gating -------------------------
    v_pad = _round_up(V, 8)                          # sublane-aligned table
    table_bytes = v_pad * d_pad * 4                  # single-buffered
    headroom = 4 * 1024 * 1024                       # compiler internal scratch

    t_cap = 512 if n_tok >= 4096 else 256            # amortize ~0.35us/step
    t_blk = min(t_cap, _round_up(n_tok, 8))

    def _fits(tb):
        return table_bytes + 2 * tb * d_pad * 4 + headroom <= int(vmem_cap * 0.9)

    while t_blk > 8 and not _fits(t_blk):
        t_blk //= 2
    t_blk = max(t_blk, 8)

    use_resident = _fits(t_blk) and not force_hbm_fallback

    if use_resident:
        n_pad = _round_up(n_tok, t_blk)
        n_blocks = n_pad // t_blk
        ids_pad = jnp.pad(flat_ids, (0, n_pad - n_tok))
        table_pad = table_pad_d
        if v_pad != V:
            table_pad = jnp.pad(table_pad_d, ((0, v_pad - V), (0, 0)))

        out_tile_bytes = t_blk * d_pad * 4
        needed = table_bytes + 2 * out_tile_bytes + headroom
        vmem_limit = min(max(needed, 16 * 1024 * 1024), vmem_cap - (2 << 20))

        # Megacore (v7x): sharding the token axis duplicates the resident table
        # per TensorCore, so only go parallel when the gathered bytes amortize
        # the extra full-table fetch.
        gathered_bytes = n_tok * d_pad * 4
        parallel_ok = n_blocks >= 4 and gathered_bytes >= 2 * table_bytes
        dim_sem = ("parallel",) if parallel_ok else ("arbitrary",)

        grid_spec = pltpu.PrefetchScalarGridSpec(
            num_scalar_prefetch=1,                   # ids -> SMEM
            grid=(n_blocks,),
            in_specs=[
                # Whole embedding table as an untiled VMEM operand: brought in
                # once, single-buffered (no hidden 2x pipeline copy).
                pl.BlockSpec(memory_space=pltpu.MemorySpace.VMEM),
            ],
            out_specs=pl.BlockSpec((t_blk, d_pad), lambda i, ids: (i, 0)),
        )

        out_flat = pl.pallas_call(
            functools.partial(_resident_gather_kernel, t_blk=t_blk),
            out_shape=jax.ShapeDtypeStruct((n_pad, d_pad), embed_table.dtype),
            grid_spec=grid_spec,
            compiler_params=pltpu.CompilerParams(
                dimension_semantics=dim_sem,
                vmem_limit_bytes=int(vmem_limit),
            ),
        )(ids_pad, table_pad)

        return out_flat[:n_tok, :D].reshape(B, S, D)

    # ---------------- HBM-resident fallback (huge vocab) ---------------------
    # Data-dependent index_map row gather: Pallas DMAs row ids[i] of the table
    # per grid step (auto double-buffered so the next row's DMA overlaps the
    # current row's store).
    n_pad = _round_up(n_tok, 8)
    ids_pad = jnp.pad(flat_ids, (0, n_pad - n_tok))
    table_3d = table_pad_d.reshape(V, 1, d_pad)

    grid_spec = pltpu.PrefetchScalarGridSpec(
        num_scalar_prefetch=1,
        grid=(n_pad,),
        in_specs=[
            pl.BlockSpec((1, 1, d_pad), lambda i, ids: (ids[i], 0, 0)),
        ],
        out_specs=pl.BlockSpec((1, 1, d_pad), lambda i, ids: (i, 0, 0)),
    )

    out_flat = pl.pallas_call(
        _hbm_row_gather_kernel,
        out_shape=jax.ShapeDtypeStruct((n_pad, 1, d_pad), embed_table.dtype),
        grid_spec=grid_spec,
        compiler_params=pltpu.CompilerParams(
            dimension_semantics=("arbitrary",),
        ),
    )(ids_pad, table_3d)

    return out_flat[:n_tok, 0, :D].reshape(B, S, D)


class WordRepPallas:
    """Deterministically-initialized stand-in for the PyTorch WordRep module."""

    def __init__(self, vocab_size, word_embed_dim, key):
        # nn.Embedding default init ~ N(0, 1); deterministic normal here.
        self.embed_table = jax.random.normal(
            key, (vocab_size, word_embed_dim), dtype=jnp.float32
        )

    def __call__(self, input_tensors):
        sentence = input_tensors[0]
        return word_rep_forward(sentence, self.embed_table)


if __name__ == "__main__":
    root = jax.random.PRNGKey(0)

    def _check(vocab_size, dim, B, S, force_hbm, key):
        k_emb, k_ids = jax.random.split(key)
        table = jax.random.normal(k_emb, (vocab_size, dim), dtype=jnp.float32)
        sentence = jax.random.randint(k_ids, (B, S), 0, vocab_size,
                                      dtype=jnp.int32)
        out = word_rep_forward(sentence, table, force_hbm_fallback=force_hbm)
        out = jax.block_until_ready(out)
        ref = jnp.take(table, sentence, axis=0)
        assert out.shape == (B, S, dim)
        assert jnp.array_equal(out, ref), "Pallas embedding gather mismatch"

    keys = jax.random.split(root, 3)
    # 1) VMEM-resident fast path, aligned dims (matches the module's typical use).
    _check(64, 128, 2, 8, False, keys[0])
    # 2) VMEM-resident path with padding (D not a multiple of 128, odd n_tok).
    _check(1000, 48, 3, 7, False, keys[1])
    # 3) HBM data-dependent row-gather fallback (forced, small shapes).
    _check(1000, 48, 3, 7, True, keys[2])

    # Module-style call, as in the original WordRep.forward([sentence]).
    model = WordRepPallas(64, 128, keys[0])
    sentence = jax.random.randint(keys[1], (2, 8), 0, 64, dtype=jnp.int32)
    out = jax.block_until_ready(model([sentence]))
    assert out.shape == (2, 8, 128)

    print("KERNEL_OK")
</pallas_src>

<mosaic_0001>
module attributes {stable_mosaic.version = 11 : i64} {
  func.func @_resident_gather_kernel(%arg0: i32, %arg1: memref<16xi32, #tpu.memory_space<smem>>, %arg2: memref<64x128xf32, #tpu.memory_space<vmem>>, %arg3: memref<16x128xf32, #tpu.memory_space<vmem>>) attributes {dimension_semantics = [#tpu.dimension_semantics<arbitrary>], iteration_bounds = array<i64: 1>, scalar_prefetch = 1 : i64, scratch_operands = 0 : i64, tpu.core_type = #tpu.core_type<tc>, window_params = [{pipeline_mode = #tpu.pipeline_mode<synchronous>, transform_indices = @transform_0, window_bounds = array<i64: 64, 128>}, {transform_indices = @transform_1, window_bounds = array<i64: 16, 128>}]} {
    %c16_i32 = arith.constant 16 : i32
    %0 = arith.muli %arg0, %c16_i32 : i32
    %c0_i32 = arith.constant 0 : i32
    %1 = arith.addi %0, %c0_i32 : i32
    %2 = arith.index_cast %1 : i32 to index
    %3 = memref.load %arg1[%2] : memref<16xi32, #tpu.memory_space<smem>>
    %4 = arith.index_cast %3 : i32 to index
    %c0 = arith.constant 0 : index
    %5 = vector.load %arg2[%4, %c0] : memref<64x128xf32, #tpu.memory_space<vmem>>, vector<1x128xf32>
    %c0_0 = arith.constant 0 : index
    %c0_1 = arith.constant 0 : index
    %6 = vector.load %arg3[%c0_0, %c0_1] : memref<16x128xf32, #tpu.memory_space<vmem>>, vector<1x128xf32>
    tpu.vector_store %arg3[%c0_0, %c0_1], %5 {strides = array<i32>} : memref<16x128xf32, #tpu.memory_space<vmem>>, vector<1x128xf32>,
    %c1_i32 = arith.constant 1 : i32
    %7 = arith.addi %0, %c1_i32 : i32
    %8 = arith.index_cast %7 : i32 to index
    %9 = memref.load %arg1[%8] : memref<16xi32, #tpu.memory_space<smem>>
    %10 = arith.index_cast %9 : i32 to index
    %c0_2 = arith.constant 0 : index
    %11 = vector.load %arg2[%10, %c0_2] : memref<64x128xf32, #tpu.memory_space<vmem>>, vector<1x128xf32>
    %c1 = arith.constant 1 : index
    %c0_3 = arith.constant 0 : index
    %12 = vector.load %arg3[%c1, %c0_3] : memref<16x128xf32, #tpu.memory_space<vmem>>, vector<1x128xf32>
    tpu.vector_store %arg3[%c1, %c0_3], %11 {strides = array<i32>} : memref<16x128xf32, #tpu.memory_space<vmem>>, vector<1x128xf32>,
    %c2_i32 = arith.constant 2 : i32
    %13 = arith.addi %0, %c2_i32 : i32
    %14 = arith.index_cast %13 : i32 to index
    %15 = memref.load %arg1[%14] : memref<16xi32, #tpu.memory_space<smem>>
    %16 = arith.index_cast %15 : i32 to index
    %c0_4 = arith.constant 0 : index
    %17 = vector.load %arg2[%16, %c0_4] : memref<64x128xf32, #tpu.memory_space<vmem>>, vector<1x128xf32>
    %c2 = arith.constant 2 : index
    %c0_5 = arith.constant 0 : index
    %18 = vector.load %arg3[%c2, %c0_5] : memref<16x128xf32, #tpu.memory_space<vmem>>, vector<1x128xf32>
    tpu.vector_store %arg3[%c2, %c0_5], %17 {strides = array<i32>} : memref<16x128xf32, #tpu.memory_space<vmem>>, vector<1x128xf32>,
    %c3_i32 = arith.constant 3 : i32
    %19 = arith.addi %0, %c3_i32 : i32
    %20 = arith.index_cast %19 : i32 to index
    %21 = memref.load %arg1[%20] : memref<16xi32, #tpu.memory_space<smem>>
    %22 = arith.index_cast %21 : i32 to index
    %c0_6 = arith.constant 0 : index
    %23 = vector.load %arg2[%22, %c0_6] : memref<64x128xf32, #tpu.memory_space<vmem>>, vector<1x128xf32>
    %c3 = arith.constant 3 : index
    %c0_7 = arith.constant 0 : index
    %24 = vector.load %arg3[%c3, %c0_7] : memref<16x128xf32, #tpu.memory_space<vmem>>, vector<1x128xf32>
    tpu.vector_store %arg3[%c3, %c0_7], %23 {strides = array<i32>} : memref<16x128xf32, #tpu.memory_space<vmem>>, vector<1x128xf32>,
    %c4_i32 = arith.constant 4 : i32
    %25 = arith.addi %0, %c4_i32 : i32
    %26 = arith.index_cast %25 : i32 to index
    %27 = memref.load %arg1[%26] : memref<16xi32, #tpu.memory_space<smem>>
    %28 = arith.index_cast %27 : i32 to index
    %c0_8 = arith.constant 0 : index
    %29 = vector.load %arg2[%28, %c0_8] : memref<64x128xf32, #tpu.memory_space<vmem>>, vector<1x128xf32>
    %c4 = arith.constant 4 : index
    %c0_9 = arith.constant 0 : index
    %30 = vector.load %arg3[%c4, %c0_9] : memref<16x128xf32, #tpu.memory_space<vmem>>, vector<1x128xf32>
    tpu.vector_store %arg3[%c4, %c0_9], %29 {strides = array<i32>} : memref<16x128xf32, #tpu.memory_space<vmem>>, vector<1x128xf32>,
    %c5_i32 = arith.constant 5 : i32
    %31 = arith.addi %0, %c5_i32 : i32
    %32 = arith.index_cast %31 : i32 to index
    %33 = memref.load %arg1[%32] : memref<16xi32, #tpu.memory_space<smem>>
    %34 = arith.index_cast %33 : i32 to index
    %c0_10 = arith.constant 0 : index
    %35 = vector.load %arg2[%34, %c0_10] : memref<64x128xf32, #tpu.memory_space<vmem>>, vector<1x128xf32>
    %c5 = arith.constant 5 : index
    %c0_11 = arith.constant 0 : index
    %36 = vector.load %arg3[%c5, %c0_11] : memref<16x128xf32, #tpu.memory_space<vmem>>, vector<1x128xf32>
    tpu.vector_store %arg3[%c5, %c0_11], %35 {strides = array<i32>} : memref<16x128xf32, #tpu.memory_space<vmem>>, vector<1x128xf32>,
    %c6_i32 = arith.constant 6 : i32
    %37 = arith.addi %0, %c6_i32 : i32
    %38 = arith.index_cast %37 : i32 to index
    %39 = memref.load %arg1[%38] : memref<16xi32, #tpu.memory_space<smem>>
    %40 = arith.index_cast %39 : i32 to index
    %c0_12 = arith.constant 0 : index
    %41 = vector.load %arg2[%40, %c0_12] : memref<64x128xf32, #tpu.memory_space<vmem>>, vector<1x128xf32>
    %c6 = arith.constant 6 : index
    %c0_13 = arith.constant 0 : index
    %42 = vector.load %arg3[%c6, %c0_13] : memref<16x128xf32, #tpu.memory_space<vmem>>, vector<1x128xf32>
    tpu.vector_store %arg3[%c6, %c0_13], %41 {strides = array<i32>} : memref<16x128xf32, #tpu.memory_space<vmem>>, vector<1x128xf32>,
    %c7_i32 = arith.constant 7 : i32
    %43 = arith.addi %0, %c7_i32 : i32
    %44 = arith.index_cast %43 : i32 to index
    %45 = memref.load %arg1[%44] : memref<16xi32, #tpu.memory_space<smem>>
    %46 = arith.index_cast %45 : i32 to index
    %c0_14 = arith.constant 0 : index
    %47 = vector.load %arg2[%46, %c0_14] : memref<64x128xf32, #tpu.memory_space<vmem>>, vector<1x128xf32>
    %c7 = arith.constant 7 : index
    %c0_15 = arith.constant 0 : index
    %48 = vector.load %arg3[%c7, %c0_15] : memref<16x128xf32, #tpu.memory_space<vmem>>, vector<1x128xf32>
    tpu.vector_store %arg3[%c7, %c0_15], %47 {strides = array<i32>} : memref<16x128xf32, #tpu.memory_space<vmem>>, vector<1x128xf32>,
    %c8_i32 = arith.constant 8 : i32
    %49 = arith.addi %0, %c8_i32 : i32
    %50 = arith.index_cast %49 : i32 to index
    %51 = memref.load %arg1[%50] : memref<16xi32, #tpu.memory_space<smem>>
    %52 = arith.index_cast %51 : i32 to index
    %c0_16 = arith.constant 0 : index
    %53 = vector.load %arg2[%52, %c0_16] : memref<64x128xf32, #tpu.memory_space<vmem>>, vector<1x128xf32>
    %c8 = arith.constant 8 : index
    %c0_17 = arith.constant 0 : index
    %54 = vector.load %arg3[%c8, %c0_17] : memref<16x128xf32, #tpu.memory_space<vmem>>, vector<1x128xf32>
    tpu.vector_store %arg3[%c8, %c0_17], %53 {strides = array<i32>} : memref<16x128xf32, #tpu.memory_space<vmem>>, vector<1x128xf32>,
    %c9_i32 = arith.constant 9 : i32
    %55 = arith.addi %0, %c9_i32 : i32
    %56 = arith.index_cast %55 : i32 to index
    %57 = memref.load %arg1[%56] : memref<16xi32, #tpu.memory_space<smem>>
    %58 = arith.index_cast %57 : i32 to index
    %c0_18 = arith.constant 0 : index
    %59 = vector.load %arg2[%58, %c0_18] : memref<64x128xf32, #tpu.memory_space<vmem>>, vector<1x128xf32>
    %c9 = arith.constant 9 : index
    %c0_19 = arith.constant 0 : index
    %60 = vector.load %arg3[%c9, %c0_19] : memref<16x128xf32, #tpu.memory_space<vmem>>, vector<1x128xf32>
    tpu.vector_store %arg3[%c9, %c0_19], %59 {strides = array<i32>} : memref<16x128xf32, #tpu.memory_space<vmem>>, vector<1x128xf32>,
    %c10_i32 = arith.constant 10 : i32
    %61 = arith.addi %0, %c10_i32 : i32
    %62 = arith.index_cast %61 : i32 to index
    %63 = memref.load %arg1[%62] : memref<16xi32, #tpu.memory_space<smem>>
    %64 = arith.index_cast %63 : i32 to index
    %c0_20 = arith.constant 0 : index
    %65 = vector.load %arg2[%64, %c0_20] : memref<64x128xf32, #tpu.memory_space<vmem>>, vector<1x128xf32>
    %c10 = arith.constant 10 : index
    %c0_21 = arith.constant 0 : index
    %66 = vector.load %arg3[%c10, %c0_21] : memref<16x128xf32, #tpu.memory_space<vmem>>, vector<1x128xf32>
    tpu.vector_store %arg3[%c10, %c0_21], %65 {strides = array<i32>} : memref<16x128xf32, #tpu.memory_space<vmem>>, vector<1x128xf32>,
    %c11_i32 = arith.constant 11 : i32
    %67 = arith.addi %0, %c11_i32 : i32
    %68 = arith.index_cast %67 : i32 to index
    %69 = memref.load %arg1[%68] : memref<16xi32, #tpu.memory_space<smem>>
    %70 = arith.index_cast %69 : i32 to index
    %c0_22 = arith.constant 0 : index
    %71 = vector.load %arg2[%70, %c0_22] : memref<64x128xf32, #tpu.memory_space<vmem>>, vector<1x128xf32>
    %c11 = arith.constant 11 : index
    %c0_23 = arith.constant 0 : index
    %72 = vector.load %arg3[%c11, %c0_23] : memref<16x128xf32, #tpu.memory_space<vmem>>, vector<1x128xf32>
    tpu.vector_store %arg3[%c11, %c0_23], %71 {strides = array<i32>} : memref<16x128xf32, #tpu.memory_space<vmem>>, vector<1x128xf32>,
    %c12_i32 = arith.constant 12 : i32
    %73 = arith.addi %0, %c12_i32 : i32
    %74 = arith.index_cast %73 : i32 to index
    %75 = memref.load %arg1[%74] : memref<16xi32, #tpu.memory_space<smem>>
    %76 = arith.index_cast %75 : i32 to index
    %c0_24 = arith.constant 0 : index
    %77 = vector.load %arg2[%76, %c0_24] : memref<64x128xf32, #tpu.memory_space<vmem>>, vector<1x128xf32>
    %c12 = arith.constant 12 : index
    %c0_25 = arith.constant 0 : index
    %78 = vector.load %arg3[%c12, %c0_25] : memref<16x128xf32, #tpu.memory_space<vmem>>, vector<1x128xf32>
    tpu.vector_store %arg3[%c12, %c0_25], %77 {strides = array<i32>} : memref<16x128xf32, #tpu.memory_space<vmem>>, vector<1x128xf32>,
    %c13_i32 = arith.constant 13 : i32
    %79 = arith.addi %0, %c13_i32 : i32
    %80 = arith.index_cast %79 : i32 to index
    %81 = memref.load %arg1[%80] : memref<16xi32, #tpu.memory_space<smem>>
    %82 = arith.index_cast %81 : i32 to index
    %c0_26 = arith.constant 0 : index
    %83 = vector.load %arg2[%82, %c0_26] : memref<64x128xf32, #tpu.memory_space<vmem>>, vector<1x128xf32>
    %c13 = arith.constant 13 : index
    %c0_27 = arith.constant 0 : index
    %84 = vector.load %arg3[%c13, %c0_27] : memref<16x128xf32, #tpu.memory_space<vmem>>, vector<1x128xf32>
    tpu.vector_store %arg3[%c13, %c0_27], %83 {strides = array<i32>} : memref<16x128xf32, #tpu.memory_space<vmem>>, vector<1x128xf32>,
    %c14_i32 = arith.constant 14 : i32
    %85 = arith.addi %0, %c14_i32 : i32
    %86 = arith.index_cast %85 : i32 to index
    %87 = memref.load %arg1[%86] : memref<16xi32, #tpu.memory_space<smem>>
    %88 = arith.index_cast %87 : i32 to index
    %c0_28 = arith.constant 0 : index
    %89 = vector.load %arg2[%88, %c0_28] : memref<64x128xf32, #tpu.memory_space<vmem>>, vector<1x128xf32>
    %c14 = arith.constant 14 : index
    %c0_29 = arith.constant 0 : index
    %90 = vector.load %arg3[%c14, %c0_29] : memref<16x128xf32, #tpu.memory_space<vmem>>, vector<1x128xf32>
    tpu.vector_store %arg3[%c14, %c0_29], %89 {strides = array<i32>} : memref<16x128xf32, #tpu.memory_space<vmem>>, vector<1x128xf32>,
    %c15_i32 = arith.constant 15 : i32
    %91 = arith.addi %0, %c15_i32 : i32
    %92 = arith.index_cast %91 : i32 to index
    %93 = memref.load %arg1[%92] : memref<16xi32, #tpu.memory_space<smem>>
    %94 = arith.index_cast %93 : i32 to index
    %c0_30 = arith.constant 0 : index
    %95 = vector.load %arg2[%94, %c0_30] : memref<64x128xf32, #tpu.memory_space<vmem>>, vector<1x128xf32>
    %c15 = arith.constant 15 : index
    %c0_31 = arith.constant 0 : index
    %96 = vector.load %arg3[%c15, %c0_31] : memref<16x128xf32, #tpu.memory_space<vmem>>, vector<1x128xf32>
    tpu.vector_store %arg3[%c15, %c0_31], %95 {strides = array<i32>} : memref<16x128xf32, #tpu.memory_space<vmem>>, vector<1x128xf32>,
    return
  }
  func.func @transform_0(%arg0: i32, %arg1: memref<16xi32, #tpu.memory_space<smem>>) -> (i32, i32) {
    %c0_i32 = arith.constant 0 : i32
    %c0_i32_0 = arith.constant 0 : i32
    %c0_i32_1 = arith.constant 0 : i32
    return %c0_i32, %c0_i32_0 : i32, i32
  }
  func.func @transform_1(%arg0: i32, %arg1: memref<16xi32, #tpu.memory_space<smem>>) -> (i32, i32) {
    %c0_i32 = arith.constant 0 : i32
    %c0_i32_0 = arith.constant 0 : i32
    return %arg0, %c0_i32 : i32, i32
  }
}

</mosaic_0001>

<bundles_post_ra>
// kernel: tpu_custom_call.1
= control target key start
LH: loop header
LB: loop body
LE: loop exit
PB: predicated region body
PF: predicated region fallthrough
CT: control target
= control target key end

     0   :  { %s295_s0 = inlined_call_operand.hbm [shape: s32[16], index: 0, kind: input, shape index: {}]   ;;  %s296_s1 = inlined_call_operand.hbm [shape: f32[64,128], index: 1, kind: input, shape index: {}]   ;;  %s297_s2 = inlined_call_operand.hbm [shape: f32[16,128], index: 2, kind: output, shape index: {}]  }
   0x1   :  { %s161_s11 = scalar_lea.hbm %s295_s0, 16 }
   0x2   :  { %p162_p0 = scmp.ne.s32.totalorder %s295_s0, %s161_s11  ;;  %p165_p1 = scmp.lt.u32.totalorder %s161_s11, %s295_s0 }
   0x4   :  { %p167_p2 = pnand %p165_p1, %p162_p0 }
   0x6   :  { %170 = shalt.err (!%p167_p2)  }
   0x7   :  { %s221_s16 = smov [#allocation3]  }
   0x8   :  { %8 = dma.hbm_to_smem %s295_s0, 16, %s221_s16, [#allocation2] }
   0x9   :  { %215 = dma.done.wait [#allocation2], 16 }
   0xa   :  { %216 = vsyncadd [#allocation2], 4294967280 }
   0xb   :  { %10 = sfence }
   0xc   :  { %11 = vsyncpa [#allocation5], 0 }
   0xd   :  { %12 = vsyncpa [#allocation6], 0  ;;  %s222_s19 = smov [#allocation4]   ;;  %s171_s23 = scalar_lea.hbm %s296_s1, 1024 }
   0xe   :  { %s18_s20 = sshll.u32 %s222_s19, 4  ;;  %p172_p3 = scmp.ne.s32.totalorder %s296_s1, %s171_s23  ;;  %s19_s20 = int_to_ptr.vmem [resolvable:$true] %s18_s20 }
   0xf   :  { %p175_p4 = scmp.lt.u32.totalorder %s171_s23, %s296_s1 }
  0x11   :  { %p177_p5 = pnand %p175_p4, %p172_p3 }
  0x13   :  { %180 = shalt.err (!%p177_p5)
}
  0x14   :  { %s181_s0 = scalar_lea.vmem %s19_s20, 1024  ;;  %p186_p7 = scmp.lt.s32.totalorder %s19_s20, %s19_s20 }
  0x15   :  { %p182_p6 = scmp.ne.s32.totalorder %s19_s20, %s181_s0  ;;  %p187_p8 = scmp.lt.s32.totalorder %s181_s0, %s181_s0 }
  0x17   :  { %p188_p9 = por %p187_p8, %p186_p7 }
  0x19   :  { %p189_p10 = pnand %p188_p9, %p182_p6 }
  0x1b   :  { %192 = shalt.err (!%p189_p10)
}
  0x1c   :  { %s223_s28 = smov 128   ;;  %s224_s29 = smov 8  }
  0x1d   :  { %24 = dma.hbm_to_vmem [thread:$0]  %s296_s1, 1024, %s19_s20, [#allocation5], %s223_s28, %s223_s28, %s224_s29  }
  0x1e   :  { %217 = dma.done.wait [#allocation5], 1024  }
  0x1f   :  { %218 = vsyncadd [#allocation5], 4294966272  ;;  %s29_s4 = sld [smem:[#allocation3]]  ;;  %s141_s5 = sld [smem:[#allocation3 + $0x1]] }
  0x20   :  { %s142_s6 = sld [smem:[#allocation3 + $0x2]]  ;;  %s143_s7 = sld [smem:[#allocation3 + $0x3]] }
  0x21   :  { %s144_s8 = sld [smem:[#allocation3 + $0x4]]  ;;  %s145_s9 = sld [smem:[#allocation3 + $0x5]] }
  0x22   :  { %s146_s10 = sld [smem:[#allocation3 + $0x6]]  ;;  %s147_s11 = sld [smem:[#allocation3 + $0x7]] }
  0x23   :  { %s268_s12 = sld [smem:[#allocation3 + $0x8]]  ;;  %s270_s13 = sld [smem:[#allocation3 + $0x9]] }
  0x24   :  { %s272_s14 = sld [smem:[#allocation3 + $0xa]]  ;;  %s274_s15 = sld [smem:[#allocation3 + $0xb]] }
  0x25   :  { %s30_s16 = scalar_lea.vmem [#allocation4], %s29_s4  ;;  %s35_s1 = scalar_lea.vmem [#allocation4], %s141_s5 }
  0x26   :  { %v31_v0 = vld [vmem:[%s30_s16] sm:$0x1]  ;;  %s40_s17 = scalar_lea.vmem [#allocation4], %s142_s6  ;;  %s45_s18 = scalar_lea.vmem [#allocation4], %s143_s7 }
  0x27   :  { %v36_v1 = vld [vmem:[%s35_s1] sm:$0x1]  ;;  %32 = vst [vmem:[#allocation7] sm:$0x1] %v31_v0  ;;  %s50_s19 = scalar_lea.vmem [#allocation4], %s144_s8  ;;  %s55_s20 = scalar_lea.vmem [#allocation4], %s145_s9 }
  0x28   :  { %37 = vst [vmem:[#allocation7 + $0x1] sm:$0x1] %v36_v1  ;;  %v41_v2 = vld [vmem:[%s40_s17] sm:$0x1]  ;;  %s60_s21 = scalar_lea.vmem [#allocation4], %s146_s10  ;;  %s65_s22 = scalar_lea.vmem [#allocation4], %s147_s11 }
  0x29   :  { %v46_v3 = vld [vmem:[%s45_s18] sm:$0x1]  ;;  %42 = vst [vmem:[#allocation7 + $0x2] sm:$0x1] %v41_v2  ;;  %s70_s23 = scalar_lea.vmem [#allocation4], %s268_s12  ;;  %s75_s24 = scalar_lea.vmem [#allocation4], %s270_s13 }
  0x2a   :  { %47 = vst [vmem:[#allocation7 + $0x3] sm:$0x1] %v46_v3  ;;  %v51_v4 = vld [vmem:[%s50_s19] sm:$0x1]  ;;  %s80_s25 = scalar_lea.vmem [#allocation4], %s272_s14  ;;  %s85_s26 = scalar_lea.vmem [#allocation4], %s274_s15 }
  0x2b   :  { %v56_v5 = vld [vmem:[%s55_s20] sm:$0x1]  ;;  %52 = vst [vmem:[#allocation7 + $0x4] sm:$0x1] %v51_v4  ;;  %s152_s27 = sld [smem:[#allocation3 + $0xc]]  ;;  %s153_s0 = sld [smem:[#allocation3 + $0xd]] }
  0x2c   :  { %57 = vst [vmem:[#allocation7 + $0x5] sm:$0x1] %v56_v5  ;;  %v61_v6 = vld [vmem:[%s60_s21] sm:$0x1]  ;;  %s154_s30 = sld [smem:[#allocation3 + $0xe]]  ;;  %s155_s3 = sld [smem:[#allocation3 + $0xf]] }
  0x2d   :  { %v66_v7 = vld [vmem:[%s65_s22] sm:$0x1]  ;;  %62 = vst [vmem:[#allocation7 + $0x6] sm:$0x1] %v61_v6  ;;  %s225_s4 = smov [#allocation7]  }
  0x2e   :  { %67 = vst [vmem:[#allocation7 + $0x7] sm:$0x1] %v66_v7  ;;  %v71_v8 = vld [vmem:[%s70_s23] sm:$0x1]  ;;  %s113_s5 = sshll.u32 %s225_s4, 4  ;;  %s114_s5 = int_to_ptr.vmem [resolvable:$true] %s113_s5 }
  0x2f   :  { %v76_v9 = vld [vmem:[%s75_s24] sm:$0x1]  ;;  %72 = vst [vmem:[#allocation7 + $0x8] sm:$0x1] %v71_v8  ;;  %s193_s10 = scalar_lea.vmem %s114_s5, 256  ;;  %p198_p12 = scmp.lt.s32.totalorder %s114_s5, %s114_s5 }
  0x30   :  { %77 = vst [vmem:[#allocation7 + $0x9] sm:$0x1] %v76_v9  ;;  %v81_v10 = vld [vmem:[%s80_s25] sm:$0x1]  ;;  %p194_p11 = scmp.ne.s32.totalorder %s114_s5, %s193_s10  ;;  %p199_p13 = scmp.lt.s32.totalorder %s193_s10, %s193_s10 }
  0x31   :  { %v86_v11 = vld [vmem:[%s85_s26] sm:$0x1]  ;;  %82 = vst [vmem:[#allocation7 + $0xa] sm:$0x1] %v81_v10  ;;  %s90_s6 = scalar_lea.vmem [#allocation4], %s152_s27  ;;  %s95_s7 = scalar_lea.vmem [#allocation4], %s153_s0 }
  0x32   :  { %87 = vst [vmem:[#allocation7 + $0xb] sm:$0x1] %v86_v11  ;;  %v91_v12 = vld [vmem:[%s90_s6] sm:$0x1]  ;;  %s100_s8 = scalar_lea.vmem [#allocation4], %s154_s30  ;;  %s105_s9 = scalar_lea.vmem [#allocation4], %s155_s3 }
  0x33   :  { %92 = vst [vmem:[#allocation7 + $0xc] sm:$0x1] %v91_v12  ;;  %v96_v13 = vld [vmem:[%s95_s7] sm:$0x1]  ;;  %p200_p0 = por %p199_p13, %p198_p12 }
  0x34   :  { %v101_v14 = vld [vmem:[%s100_s8] sm:$0x1]  ;;  %97 = vst [vmem:[#allocation7 + $0xd] sm:$0x1] %v96_v13 }
  0x35   :  { %102 = vst [vmem:[#allocation7 + $0xe] sm:$0x1] %v101_v14  ;;  %v106_v15 = vld [vmem:[%s105_s9] sm:$0x1]  ;;  %p201_p1 = pnand %p200_p0, %p194_p11 }
  0x36   :  { %107 = vst [vmem:[#allocation7 + $0xf] sm:$0x1] %v106_v15 }
  0x37   :  { %204 = shalt.err (!%p201_p1)
}
  0x38   :  { %s205_s13 = scalar_lea.hbm %s297_s2, 256 }
  0x39   :  { %p206_p2 = scmp.ne.s32.totalorder %s297_s2, %s205_s13  ;;  %p209_p3 = scmp.lt.u32.totalorder %s205_s13, %s297_s2 }
  0x3b   :  { %p211_p4 = pnand %p209_p3, %p206_p2 }
  0x3d   :  { %214 = shalt.err (!%p211_p4)
}
  0x3e   :  { %119 = dma.vmem_to_hbm [thread:$0]  %s114_s5, 256, %s297_s2, [#allocation6], %s223_s28, %s223_s28, %s224_s29  }
  0x3f   :  { %219 = dma.done.wait [#allocation6], 256  }
  0x40   :  { %220 = vsyncadd [#allocation6], 4294967040 }
  0x41   :  { %123 = vsyncpa [#allocation5], 1 }
  0x42   :  { %124 = vsyncpa [#allocation6], 1 }

</bundles_post_ra>
